<compile_context>
chip_gen: v5e
topology: v5e:2x2
jax: 0.10.0
libtpu: 0.0.40
codegen_flags: <defaults>
</compile_context>

<pallas_src>
import functools

import jax
import jax.numpy as jnp
from jax.experimental import pallas as pl
from jax.experimental.pallas import tpu as pltpu

_LANE = 128
# Explicit scoped-VMEM budget: safe on every generation (v5e/v6e default 16/32
# MiB scoped; v7x has 64 MiB physical VMEM).
_VMEM_LIMIT_BYTES = 32 * 1024 * 1024
# Per-block slab budget. Input + output, each double-buffered, gives a working
# set of ~4x this (~24 MiB), comfortably under the VMEM limit above.
_SLAB_BUDGET_BYTES = 6 * 1024 * 1024


def _round_up(n, m):
    return ((n + m - 1) // m) * m


def _channel_gate(y, w_ref):
    """k=3 zero-padded 1-D conv along the channel (lane) axis + sigmoid.

    y: (n, C) f32 pooled means. w_ref: (3,) f32 in SMEM. Returns (n, C) f32.
    """
    n, C = y.shape
    c_idx = jax.lax.broadcasted_iota(jnp.int32, (n, C), 1)
    y_left = jnp.where(c_idx >= 1, jnp.roll(y, 1, axis=1), 0.0)        # y[c-1]
    y_right = jnp.where(c_idx <= C - 2, jnp.roll(y, -1, axis=1), 0.0)  # y[c+1]
    conv = w_ref[0] * y_left + w_ref[1] * y + w_ref[2] * y_right
    # Tiny (n, C) tensor; exp routes to the EUP slot, cost is negligible.
    return jax.nn.sigmoid(conv)


def _eca_fused_kernel(w_ref, x_ref, o_ref, *, inv_hw):
    # w_ref: (3,) f32 SMEM conv weights.
    # x_ref / o_ref: (B_TILE, C, HW_pad) VMEM (spatial axis zero-padded).
    x = x_ref[...]
    # Pool in f32 for accumulation accuracy; zero-padded lanes add nothing,
    # divide by the *true* H*W.
    y = jnp.sum(x.astype(jnp.float32), axis=-1) * inv_hw          # (B_TILE, C)
    gate = _channel_gate(y, w_ref).astype(x.dtype)                # (B_TILE, C)
    # Scale in the input dtype: no full-slab upcast on the store path.
    o_ref[...] = x * gate[:, :, None]


def _eca_pool_kernel(w_ref, x_ref, gate_ref, acc_ref, *, inv_hw):
    # Split path, phase 1: accumulate per-channel sums across HW tiles and
    # emit the (1, 1, C) f32 sigmoid gate on the last HW step.
    t = pl.program_id(1)

    @pl.when(t == 0)
    def _():
        acc_ref[...] = jnp.zeros_like(acc_ref)

    acc_ref[...] += jnp.sum(x_ref[...].astype(jnp.float32), axis=-1)   # (1, C)

    @pl.when(t == pl.num_programs(1) - 1)
    def _():
        y = acc_ref[...] * inv_hw                                      # (1, C)
        gate_ref[...] = _channel_gate(y, w_ref)[:, None, :]            # (1,1,C)


def _eca_scale_kernel(gate_ref, x_ref, o_ref):
    # Split path, phase 2: lane-dense elementwise scaling of one HW tile.
    gate = gate_ref[0].astype(o_ref.dtype)                             # (1, C)
    o_ref[...] = x_ref[...] * gate[:, :, None]


def eca_forward(x, conv_weight, *, force_split=False, split_tile_hw=None):
    """ECA forward. x: (B, C, H, W). conv_weight: (3,) f32 (k=3 conv, no bias)."""
    B, C, H, W = x.shape
    HW = H * W
    itemsize = jnp.dtype(x.dtype).itemsize
    inv_hw = 1.0 / float(HW)

    # Lane-dense spatial axis: pad H*W up to a multiple of 128 with zeros.
    hw_pad = _round_up(HW, _LANE)
    slab_bytes = C * hw_pad * itemsize          # one (C, HW_pad) slab

    use_fused = (not force_split) and slab_bytes <= _SLAB_BUDGET_BYTES

    if use_fused:
        # Fused single-pass kernel; pack several batch elements per grid step
        # so small feature maps are not per-step-overhead dominated.
        b_tile = int(max(1, min(B, _SLAB_BUDGET_BYTES // slab_bytes)))
        x3 = x.reshape(B, C, HW)
        if hw_pad != HW:
            x3 = jnp.pad(x3, ((0, 0), (0, 0), (0, hw_pad - HW)))
        out3 = pl.pallas_call(
            functools.partial(_eca_fused_kernel, inv_hw=inv_hw),
            out_shape=jax.ShapeDtypeStruct((B, C, hw_pad), x.dtype),
            grid=(pl.cdiv(B, b_tile),),
            in_specs=[
                pl.BlockSpec(memory_space=pltpu.SMEM),                   # weights
                pl.BlockSpec((b_tile, C, hw_pad), lambda b: (b, 0, 0)),  # x slab
            ],
            out_specs=pl.BlockSpec((b_tile, C, hw_pad), lambda b: (b, 0, 0)),
            compiler_params=pltpu.CompilerParams(
                dimension_semantics=("parallel",),
                vmem_limit_bytes=_VMEM_LIMIT_BYTES,
            ),
        )(conv_weight, x3)
        return out3[:, :, :HW].reshape(B, C, H, W)

    # Split (two-kernel) fallback for large feature maps: pooled gate first,
    # then an HW-tiled elementwise scale with two parallel grid axes.
    if split_tile_hw is None:
        tile_hw = max(_LANE,
                      (_SLAB_BUDGET_BYTES // (C * itemsize)) // _LANE * _LANE)
    else:
        tile_hw = _round_up(int(split_tile_hw), _LANE)
    tile_hw = min(tile_hw, _round_up(HW, _LANE))
    hw_pad = _round_up(HW, tile_hw)     # pad to a whole number of HW tiles
    n_hw = hw_pad // tile_hw

    x3 = x.reshape(B, C, HW)
    if hw_pad != HW:
        # Zero padding keeps the pooled sums exact.
        x3 = jnp.pad(x3, ((0, 0), (0, 0), (0, hw_pad - HW)))

    gate = pl.pallas_call(
        functools.partial(_eca_pool_kernel, inv_hw=inv_hw),
        out_shape=jax.ShapeDtypeStruct((B, 1, C), jnp.float32),
        grid=(B, n_hw),
        in_specs=[
            pl.BlockSpec(memory_space=pltpu.SMEM),                       # weights
            pl.BlockSpec((1, C, tile_hw), lambda b, t: (b, 0, t)),       # x tile
        ],
        out_specs=pl.BlockSpec((1, 1, C), lambda b, t: (b, 0, 0)),
        scratch_shapes=[pltpu.VMEM((1, C), jnp.float32)],
        compiler_params=pltpu.CompilerParams(
            dimension_semantics=("parallel", "arbitrary"),
            vmem_limit_bytes=_VMEM_LIMIT_BYTES,
        ),
    )(conv_weight, x3)

    out3 = pl.pallas_call(
        _eca_scale_kernel,
        out_shape=jax.ShapeDtypeStruct((B, C, hw_pad), x.dtype),
        grid=(B, n_hw),
        in_specs=[
            pl.BlockSpec((1, 1, C), lambda b, t: (b, 0, 0)),             # gate
            pl.BlockSpec((1, C, tile_hw), lambda b, t: (b, 0, t)),       # x tile
        ],
        out_specs=pl.BlockSpec((1, C, tile_hw), lambda b, t: (b, 0, t)),
        compiler_params=pltpu.CompilerParams(
            dimension_semantics=("parallel", "parallel"),
            vmem_limit_bytes=_VMEM_LIMIT_BYTES,
        ),
    )(gate, x3)
    return out3[:, :, :HW].reshape(B, C, H, W)


def eca_reference(x, conv_weight):
    """Pure-JAX reference of the intended ECA forward (for verification)."""
    y = jnp.mean(x, axis=(2, 3))                 # (B, C)
    yp = jnp.pad(y, ((0, 0), (1, 1)))            # zero pad along channels
    conv = (conv_weight[0] * yp[:, :-2]
            + conv_weight[1] * yp[:, 1:-1]
            + conv_weight[2] * yp[:, 2:])
    gate = jax.nn.sigmoid(conv)
    return x * gate[:, :, None, None]


if __name__ == "__main__":
    key = jax.random.PRNGKey(0)
    kx, kw, kx2, kx3 = jax.random.split(key, 4)

    # Deterministic Conv1d(1, 1, 3, bias=False) weight, PyTorch-style
    # kaiming-uniform bound = 1 / sqrt(in_channels * kernel_size) = 1/sqrt(3).
    bound = 1.0 / jnp.sqrt(3.0)
    conv_weight = jax.random.uniform(
        kw, (3,), dtype=jnp.float32, minval=-bound, maxval=bound
    )

    # Case 1: small, lane-aligned feature map -> fused path, B_TILE = B.
    B, C, H, W = 2, 8, 16, 16
    x = jax.random.normal(kx, (B, C, H, W), dtype=jnp.float32)
    out = jax.block_until_ready(eca_forward(x, conv_weight))
    ref = eca_reference(x, conv_weight)
    assert out.shape == x.shape and out.dtype == x.dtype
    assert jnp.allclose(out, ref, atol=1e-5, rtol=1e-5), "fused path mismatch"

    # Case 2: non-128-multiple spatial size through the fused path (tests the
    # lane padding + batch tiling with b_tile > 1 and odd C).
    B2, C2, H2, W2 = 3, 4, 7, 7
    x2 = jax.random.normal(kx2, (B2, C2, H2, W2), dtype=jnp.float32)
    out2 = jax.block_until_ready(eca_forward(x2, conv_weight))
    ref2 = eca_reference(x2, conv_weight)
    assert out2.shape == x2.shape and out2.dtype == x2.dtype
    assert jnp.allclose(out2, ref2, atol=1e-5, rtol=1e-5), "padded fused mismatch"

    # Case 3: force the large-feature-map split (pool + scale) fallback with
    # two HW tiles to validate the accumulator / gate path.
    B3, C3, H3, W3 = 2, 8, 9, 15
    x3 = jax.random.normal(kx3, (B3, C3, H3, W3), dtype=jnp.float32)
    out3 = jax.block_until_ready(
        eca_forward(x3, conv_weight, force_split=True, split_tile_hw=128))
    ref3 = eca_reference(x3, conv_weight)
    assert out3.shape == x3.shape and out3.dtype == x3.dtype
    assert jnp.allclose(out3, ref3, atol=1e-5, rtol=1e-5), "split path mismatch"

    print("KERNEL_OK")
</pallas_src>

<mosaic_0001>
module attributes {stable_mosaic.version = 11 : i64} {
  func.func @_eca_fused_kernel(%arg0: i32, %arg1: memref<3xf32, #tpu.memory_space<smem>>, %arg2: memref<2x8x256xf32, #tpu.memory_space<vmem>>, %arg3: memref<2x8x256xf32, #tpu.memory_space<vmem>>) attributes {dimension_semantics = [#tpu.dimension_semantics<parallel>], iteration_bounds = array<i64: 1>, scalar_prefetch = 0 : i64, scratch_operands = 0 : i64, tpu.core_type = #tpu.core_type<tc>, window_params = [{transform_indices = @transform_0, window_bounds = array<i64: 3>}, {transform_indices = @transform_1, window_bounds = array<i64: 2, 8, 256>}, {transform_indices = @transform_2, window_bounds = array<i64: 2, 8, 256>}]} {
    %c0 = arith.constant 0 : index
    %c0_0 = arith.constant 0 : index
    %c0_1 = arith.constant 0 : index
    %0 = vector.load %arg2[%c0, %c0_0, %c0_1] : memref<2x8x256xf32, #tpu.memory_space<vmem>>, vector<2x8x256xf32>
    %cst = arith.constant dense<0.000000e+00> : vector<2x8xf32>
    %1 = vector.multi_reduction <add>, %0, %cst [2] : vector<2x8x256xf32> to vector<2x8xf32>
    %cst_2 = arith.constant 3.906250e-03 : f32
    %2 = vector.broadcast %cst_2 : f32 to vector<2x8xf32>
    %3 = arith.mulf %1, %2 : vector<2x8xf32>
    %4 = tpu.iota {dimensions = array<i32: 1>} : vector<2x8xi32>
    %c1_i32 = arith.constant 1 : i32
    %5 = vector.broadcast %c1_i32 : i32 to vector<2x8xi32>
    %6 = arith.cmpi sge, %4, %5 : vector<2x8xi32>
    %7 = vector.extract_strided_slice %3 {offsets = [0, 7], sizes = [2, 1], strides = [1, 1]} : vector<2x8xf32> to vector<2x1xf32>
    %8 = vector.extract_strided_slice %3 {offsets = [0, 0], sizes = [2, 7], strides = [1, 1]} : vector<2x8xf32> to vector<2x7xf32>
    %9 = tpu.concatenate %7, %8 in 1 : vector<2x1xf32>, vector<2x7xf32> -> vector<2x8xf32>
    %cst_3 = arith.constant 0.000000e+00 : f32
    %10 = vector.broadcast %cst_3 : f32 to vector<2x8xf32>
    %11 = arith.select %6, %9, %10 : vector<2x8xi1>, vector<2x8xf32>
    %c6_i32 = arith.constant 6 : i32
    %12 = vector.broadcast %c6_i32 : i32 to vector<2x8xi32>
    %13 = arith.cmpi sle, %4, %12 : vector<2x8xi32>
    %14 = vector.extract_strided_slice %3 {offsets = [0, 1], sizes = [2, 7], strides = [1, 1]} : vector<2x8xf32> to vector<2x7xf32>
    %15 = vector.extract_strided_slice %3 {offsets = [0, 0], sizes = [2, 1], strides = [1, 1]} : vector<2x8xf32> to vector<2x1xf32>
    %16 = tpu.concatenate %14, %15 in 1 : vector<2x7xf32>, vector<2x1xf32> -> vector<2x8xf32>
    %cst_4 = arith.constant 0.000000e+00 : f32
    %17 = vector.broadcast %cst_4 : f32 to vector<2x8xf32>
    %18 = arith.select %13, %16, %17 : vector<2x8xi1>, vector<2x8xf32>
    %c0_5 = arith.constant 0 : index
    %19 = memref.load %arg1[%c0_5] : memref<3xf32, #tpu.memory_space<smem>>
    %20 = vector.broadcast %19 : f32 to vector<2x8xf32>
    %21 = arith.mulf %20, %11 : vector<2x8xf32>
    %c1 = arith.constant 1 : index
    %22 = memref.load %arg1[%c1] : memref<3xf32, #tpu.memory_space<smem>>
    %23 = vector.broadcast %22 : f32 to vector<2x8xf32>
    %24 = arith.mulf %23, %3 : vector<2x8xf32>
    %25 = arith.addf %21, %24 : vector<2x8xf32>
    %c2 = arith.constant 2 : index
    %26 = memref.load %arg1[%c2] : memref<3xf32, #tpu.memory_space<smem>>
    %27 = vector.broadcast %26 : f32 to vector<2x8xf32>
    %28 = arith.mulf %27, %18 : vector<2x8xf32>
    %29 = arith.addf %25, %28 : vector<2x8xf32>
    %30 = arith.negf %29 : vector<2x8xf32>
    %31 = math.exp %30 : vector<2x8xf32>
    %cst_6 = arith.constant 1.000000e+00 : f32
    %32 = vector.broadcast %cst_6 : f32 to vector<2x8xf32>
    %33 = arith.addf %32, %31 : vector<2x8xf32>
    %34 = arith.divf %32, %33 : vector<2x8xf32>
    %35 = vector.shape_cast %34 : vector<2x8xf32> to vector<2x8x1xf32>
    %36 = vector.broadcast %35 : vector<2x8x1xf32> to vector<2x8x256xf32>
    %37 = arith.mulf %0, %36 : vector<2x8x256xf32>
    %c0_7 = arith.constant 0 : index
    %c0_8 = arith.constant 0 : index
    %c0_9 = arith.constant 0 : index
    %38 = vector.load %arg3[%c0_7, %c0_8, %c0_9] : memref<2x8x256xf32, #tpu.memory_space<vmem>>, vector<2x8x256xf32>
    tpu.vector_store %arg3[%c0_7, %c0_8, %c0_9], %37 {strides = array<i32>} : memref<2x8x256xf32, #tpu.memory_space<vmem>>, vector<2x8x256xf32>,
    return
  }
  func.func @transform_0(%arg0: i32) -> i32 {
    %c0_i32 = arith.constant 0 : i32
    %c0_i32_0 = arith.constant 0 : i32
    return %c0_i32 : i32
  }
  func.func @transform_1(%arg0: i32) -> (i32, i32, i32) {
    %c0_i32 = arith.constant 0 : i32
    %c0_i32_0 = arith.constant 0 : i32
    %c0_i32_1 = arith.constant 0 : i32
    return %arg0, %c0_i32, %c0_i32_0 : i32, i32, i32
  }
  func.func @transform_2(%arg0: i32) -> (i32, i32, i32) {
    %c0_i32 = arith.constant 0 : i32
    %c0_i32_0 = arith.constant 0 : i32
    %c0_i32_1 = arith.constant 0 : i32
    return %arg0, %c0_i32, %c0_i32_0 : i32, i32, i32
  }
}

</mosaic_0001>

<bundles_post_ra>
// kernel: tpu_custom_call.1
= control target key start
LH: loop header
LB: loop body
LE: loop exit
PB: predicated region body
PF: predicated region fallthrough
CT: control target
= control target key end

     0   :  { %7 = vsyncpa [#allocation5], 0  ;;  %s335_s0 = inlined_call_operand.hbm [shape: f32[3], index: 0, kind: input, shape index: {}]   ;;  %s336_s1 = inlined_call_operand.hbm [shape: f32[2,8,256], index: 1, kind: input, shape index: {}]   ;;  %s337_s2 = inlined_call_operand.hbm [shape: f32[2,8,256], index: 2, kind: output, shape index: {}]  }
   0x1   :  { %8 = vsyncpa [#allocation3], 0 }
   0x2   :  { %9 = vsyncpa [#allocation4], 0  ;;  %s15_s11 = sshll.u32 %s335_s0, 4  ;;  %s23_s14 = sshll.u32 %s336_s1, 4  ;;  %s16_s11 = int_to_ptr.hbm [resolvable:$true] %s15_s11  ;;  %s24_s14 = int_to_ptr.hbm [resolvable:$true] %s23_s14 }
   0x3   :  { %s274_s15 = smov [#allocation2]   ;;  %s275_s16 = smov [#allocation6]  }
   0x4   :  { %18 = dma.hbm_to_smem %s16_s11, 16, %s274_s15, [#allocation5]  }
   0x5   :  { %s25_s17 = sshll.u32 %s275_s16, 4  ;;  %s276_s18 = smov 256   ;;  %s26_s17 = int_to_ptr.vmem [resolvable:$true] %s25_s17 }
   0x6   :  { %s277_s19 = smov 16  }
   0x7   :  { %31 = dma.hbm_to_vmem [thread:$0]  %s24_s14, 512, %s26_s17, [#allocation3], %s276_s18, %s276_s18, %s277_s19  }
   0x8   :  { %268 = dma.done.wait [#allocation5], 16  }
   0x9   :  { %269 = vsyncadd [#allocation5], 4294967280 }
   0xa   :  { %270 = dma.done.wait [#allocation3], 512  }
   0xb   :  { %271 = vsyncadd [#allocation3], 4294966784 }
   0xc   :  { %40 = sfence }
   0xd   :  { %v303_v0 = vld [vmem:[#allocation6] sm:$0xff]  ;;  %v305_v1 = vld [vmem:[#allocation6 + $0x8] sm:$0xff]  ;;  %v309_v3 = vld [vmem:[#allocation6 + $0x10] sm:$0xff]  ;;  %v53_v6 = vlaneseq  ;;  %s189_s0 = sld [smem:[#allocation2 + $0x1]]  ;;  %vm66_vm0 = vcmask 7168   ;;  %vm75_vm2 = vcmask 1042434  }
   0xe   :  { %v45_v2 = vadd.f32 %v305_v1, %v303_v0  ;;  %v311_v4 = vld [vmem:[#allocation6 + $0x18] sm:$0xff]  ;;  %s315_s1 = sld [smem:[#allocation2]]  ;;  %vm82_vm3 = vcmask 56320   ;;  %s278_s21 = smov [#allocation7]  }
   0xf   :  { %v48_v5 = vadd.f32 %v311_v4, %v309_v3  ;;  %v149_v7 = vshrl.u32 %v53_v6, 7  ;;  %v54_v8 = vand.u32 127, %v53_v6  ;;  %s317_s20 = sld [smem:[#allocation2 + $0x2]]  ;;  %s173_s22 = sshll.u32 %s278_s21, 4  ;;  %s174_s22 = int_to_ptr.vmem [resolvable:$true] %s173_s22 }
  0x10   :  { %46 = vadd.xlane.f32.xlu0 %v45_v2  ;;  %s175_s25 = sshll.u32 %s337_s2, 4  ;;  %s176_s25 = int_to_ptr.hbm [resolvable:$true] %s175_s25 }
  0x11   :  { %198 = vset.pattern.permute.xlu1 %v149_v7  ;;  %199 = vset.pattern.permute.xlu0 %v149_v7  ;;  %v61_v11 = vadd.s32 4294967295, %v54_v8  ;;  %v72_v14 = vadd.s32 1, %v54_v8  ;;  %vm55_vm1 = vcmp.ge.s32.totalorder %v54_v8, 1  ;;  %vm71_vm4 = vcmp.le.s32.totalorder %v54_v8, 6 }
  0x13   :  { %v90_v17 = vstv %s189_s0 }
  0x14   :  { %v86_v19 = vstv %s315_s1 }
  0x15   :  { %v102_v31 = vstv %s317_s20 }
  0x18   :  { %49 = vadd.xlane.f32.xlu0 %v48_v5 }
  0x83   :  { %v47_v9 = vpop.xlane.xlu0 %46 }
  0x84   :  { %v51_v10 = vmul.f32 0.00390625, %v47_v9 }
  0x86   :  { %v62_v12 = vperm.slane %v51_v10, %v61_v11  ;;  %v78_v18 = vrot.slane %v51_v10, 7  ;;  %v73_v24 = vperm.slane %v51_v10, %v72_v14  ;;  %v91_v27 = vmul.f32 %v90_v17, %v51_v10 }
  0x88   :  { %v67_v16 = vsel %vm66_vm0, %v51_v10, %v62_v12  ;;  %v95_v38 = vperm.slane %v91_v27, %v54_v8 }
  0x89   :  { %v69_v26 = vsel %vm55_vm1, %v67_v16, 0.0 }
  0x8a   :  { %v87_v35 = vmul.f32 %v86_v19, %v69_v26 }
  0x8b   :  { %v50_v13 = vpop.xlane.xlu0 %49 }
  0x8c   :  { %v52_v15 = vmul.f32 0.00390625, %v50_v13  ;;  %v99_v41 = vadd.f32 %v95_v38, %v87_v35 }
  0x8e   :  { %v58_v20 = vrot.slane %v52_v15, 7  ;;  %v79_v21 = vrot.slane %v52_v15, 6  ;;  %v92_v22 = vmul.f32 %v90_v17, %v52_v15  ;;  %v63_v23 = vperm.slane %v52_v15, %v61_v11 }
  0x8f   :  { %v74_v25 = vperm.slane %v52_v15, %v72_v14 }
  0x90   :  { %v80_v28 = vsel %vm75_vm2, %v79_v21, %v78_v18  ;;  %v68_v29 = vsel %vm66_vm0, %v58_v20, %v63_v23  ;;  %v96_v33 = vperm.slane %v92_v22, %v54_v8 }
  0x91   :  { %v76_v30 = vsel %vm75_vm2, %v74_v25, %v73_v24  ;;  %v70_v32 = vsel %vm55_vm1, %v68_v29, 0.0 }
  0x92   :  { %v83_v34 = vsel %vm82_vm3, %v76_v30, %v80_v28  ;;  %v88_v36 = vmul.f32 %v86_v19, %v70_v32 }
  0x93   :  { %v84_v37 = vsel %vm71_vm4, %v83_v34, 0.0 }
  0x94   :  { %v103_v39 = vmul.f32 %v102_v31, %v84_v37  ;;  %v100_v40 = vadd.f32 %v96_v33, %v88_v36 }
  0x96   :  { %v105_v42 = vrot.slane %v103_v39, 2 }
  0x98   :  { %v107_v43 = vadd.f32 %v105_v42, %v99_v41  ;;  %v108_v44 = vadd.f32 %v105_v42, %v100_v40 }
  0x9a   :  { %v191_v45 = vmul.f32 -1.442695, %v107_v43  ;;  %v192_v46 = vmul.f32 -1.442695, %v108_v44 }
  0x9c   :  { %200 = vpow2.f32 %v191_v45 }
  0x9d   :  { %202 = vpow2.f32 %v192_v46 }
  0xa2   :  { %v201_v47 = vpop.eup %200 }
  0xa3   :  { %v203_v48 = vpop.eup %202  ;;  %v115_v49 = vadd.f32 1.0, %v201_v47 }
  0xa4   :  { %v116_v50 = vadd.f32 1.0, %v203_v48 }
  0xa5   :  { %204 = vrcp.f32 %v115_v49  ;;  %v128_v56 = vand.u32 2147483648, %v115_v49  ;;  %v126_v59 = vand.u32 2147483647, %v115_v49  ;;  %vm122_vm6 = vweird.f32 %v115_v49 }
  0xa6   :  { %206 = vrcp.f32 %v116_v50  ;;  %v143_v6 = vand.u32 2147483648, %v116_v50  ;;  %vm137_vm10 = vweird.f32 %v116_v50  ;;  %v141_v8 = vand.u32 2147483647, %v116_v50 }
  0xa7   :  { %v129_v62 = vor.u32 1.1754944e-38, %v128_v56  ;;  %vm127_vm8 = vcmp.eq.f32.partialorder %v126_v59, 8.507059e+37 }
  0xa8   :  { %v144_v10 = vor.u32 1.1754944e-38, %v143_v6  ;;  %vm142_vm12 = vcmp.eq.f32.partialorder %v141_v8, 8.507059e+37 }
  0xab   :  { %v205_v51 = vpop.eup %204 }
  0xac   :  { %v207_v52 = vpop.eup %206  ;;  %v118_v53 = vmul.f32 %v205_v51, %v115_v49  ;;  %vm123_vm5 = vweird.f32 %v205_v51 }
  0xad   :  { %v133_v54 = vmul.f32 %v207_v52, %v116_v50  ;;  %vm124_vm7 = vmor %vm122_vm6, %vm123_vm5  ;;  %vm138_vm9 = vweird.f32 %v207_v52 }
  0xae   :  { %v119_v55 = vsub.f32 1.0, %v118_v53  ;;  %vm139_vm11 = vmor %vm137_vm10, %vm138_vm9 }
  0xaf   :  { %v134_v57 = vsub.f32 1.0, %v133_v54 }
  0xb0   :  { %v120_v58 = vmul.f32 %v205_v51, %v119_v55 }
  0xb1   :  { %v135_v60 = vmul.f32 %v207_v52, %v134_v57 }
  0xb2   :  { %v121_v61 = vadd.f32 %v205_v51, %v120_v58 }
  0xb3   :  { %v136_v2 = vadd.f32 %v207_v52, %v135_v60 }
  0xb4   :  { %v125_v63 = vsel %vm124_vm7, %v205_v51, %v121_v61 }
  0xb5   :  { %v130_v5 = vsel %vm127_vm8, %v129_v62, %v125_v63  ;;  %v140_v9 = vsel %vm139_vm11, %v207_v52, %v136_v2 }
  0xb6   :  { %v147_v7 = vperm.slane %v130_v5, 7  ;;  %v145_v11 = vsel %vm142_vm12, %v144_v10, %v140_v9 }
  0xb7   :  { %v154_v12 = vperm.slane %v145_v11, 0 }
  0xb8   :  { %152 = vperm.xlu1 %198, %v147_v7  }
  0xc0   :  { %159 = vperm.xlu1 %198, %v154_v12  }
 0x12a   :  { %v153_v13 = vpop.permute.xlu1 %152 }
 0x12b   :  { %v161_v14 = vmul.f32 %v153_v13, %v303_v0  ;;  %v162_v15 = vmul.f32 %v153_v13, %v305_v1 }
 0x12d   :  { %165 = vst [vmem:[#allocation7] sm:$0xff] %v161_v14 }
 0x12e   :  { %166 = vst [vmem:[#allocation7 + $0x8] sm:$0xff] %v162_v15 }
 0x132   :  { %v160_v16 = vpop.permute.xlu1 %159 }
 0x133   :  { %v163_v17 = vmul.f32 %v160_v16, %v309_v3  ;;  %v164_v18 = vmul.f32 %v160_v16, %v311_v4 }
 0x135   :  { %167 = vst [vmem:[#allocation7 + $0x10] sm:$0xff] %v163_v17 }
 0x136   :  { %168 = vst [vmem:[#allocation7 + $0x18] sm:$0xff] %v164_v18 }
 0x137   :  { %181 = dma.vmem_to_hbm [thread:$0]  %s174_s22, 512, %s176_s25, [#allocation4], %s276_s18, %s276_s18, %s277_s19  }
 0x138   :  { %272 = dma.done.wait [#allocation4], 512  }
 0x139   :  { %273 = vsyncadd [#allocation4], 4294966784 }
 0x13a   :  { %186 = vsyncpa [#allocation3], 1 }
 0x13b   :  { %187 = vsyncpa [#allocation4], 1 }
 0x13c   :  { %188 = vsyncpa [#allocation5], 1 }

</bundles_post_ra>
